<compile_context>
chip_gen: v5e
topology: v5e:2x2
jax: 0.10.0
libtpu: 0.0.40
codegen_flags: <defaults>
</compile_context>

<pallas_src>
import jax
import jax.numpy as jnp
from jax.experimental import pallas as pl
from jax.experimental.pallas import tpu as pltpu


# ----------------------------------------------------------------------------
# small math helpers (usable both inside kernels and in the JAX reference)
# ----------------------------------------------------------------------------
def _mish(x):
    # numerically stable softplus, then x * tanh(softplus(x))
    sp = jnp.maximum(x, 0.0) + jnp.log(1.0 + jnp.exp(-jnp.abs(x)))
    return x * jnp.tanh(sp)


def _sigmoid(x):
    return 1.0 / (1.0 + jnp.exp(-x))


# ----------------------------------------------------------------------------
# Pallas kernels
# ----------------------------------------------------------------------------
def bn_act_kernel(x_ref, s_ref, t_ref, o_ref):
    """mish(bn1(x)) — (HW, Cin) tile, per-channel scale/shift on the lane axis."""
    x = x_ref[0]                                            # (HW, Cin)
    o_ref[0] = _mish(x * s_ref[...] + t_ref[...])


def conv_head_kernel(wins_ref, w_ref, t2_ref, we_ref, tn1_ref, feat_ref, enc_ref):
    """3x3 conv (9 tap-matmuls) + BN2 + mish, then EncModule 1x1 conv + norm1 + mish.

    wins_ref: (1, 9, HW, Cin) — the nine shifted 3x3 tap views (wrapper im2col).
    w_ref:    (9, Cin, Ch)    — tap weights with the bn2 scale folded in.
    """
    ch = w_ref.shape[2]
    hw = wins_ref.shape[2]
    acc = jnp.zeros((hw, ch), jnp.float32)
    for k in range(9):
        acc = acc + jnp.dot(wins_ref[0, k], w_ref[k],
                            preferred_element_type=jnp.float32)
    feat = _mish(acc + t2_ref[...])                         # (HW, Ch)
    feat_ref[0] = feat
    enc_ref[0] = _mish(
        jnp.dot(feat, we_ref[...], preferred_element_type=jnp.float32)
        + tn1_ref[...])


def encode_kernel(x_ref, cwt_ref, cw_ref, srow_ref, sc2_ref, n2s_ref, n2t_ref,
                  wl_ref, bl_ref, ws_ref, bs_ref, gamma_ref, se_ref):
    """Encoding (scaled L2 softmax + aggregate) + norm2 + mish + mean
    + gating linear/sigmoid + SE-loss linear."""
    x = x_ref[0]                                            # (HW, C)

    # scaled L2:  s_k * (||x_i||^2 - 2 x_i.c_k + ||c_k||^2)
    x2 = jnp.sum(x * x, axis=1, keepdims=True)              # (HW, 1)
    cross = jnp.dot(x, cwt_ref[...],                        # cwt already * (-2*s_k)
                    preferred_element_type=jnp.float32)     # (HW, K)
    logits = srow_ref[...] * x2 + cross + sc2_ref[...]      # (HW, K)

    # softmax over codes (lane axis)
    m = jnp.max(logits, axis=1, keepdims=True)
    e = jnp.exp(logits - m)
    aw = e / jnp.sum(e, axis=1, keepdims=True)              # (HW, K)

    # aggregate: ef[k,c] = sum_i aw[i,k] * (x[i,c] - cw[k,c])
    awt = aw.T                                              # (K, HW)
    ef = jnp.dot(awt, x, preferred_element_type=jnp.float32)            # (K, C)
    ef = ef - jnp.sum(awt, axis=1, keepdims=True) * cw_ref[...]
    ef = _mish(ef * n2s_ref[...] + n2t_ref[...])            # BN1d(codes) + mish

    enc_mean = jnp.mean(ef, axis=0, keepdims=True)          # (1, C)
    gamma_ref[0] = _sigmoid(
        jnp.dot(enc_mean, wl_ref[...], preferred_element_type=jnp.float32)
        + bl_ref[...])
    se_ref[0] = (jnp.dot(enc_mean, ws_ref[...], preferred_element_type=jnp.float32)
                 + bs_ref[...])


def gate_upsample_kernel(featT_ref, gamma_ref, w6t_ref, b6_ref, mT_ref, o_ref):
    """mish(feat + feat*gamma) + conv6 (1x1) + bilinear upsample.

    Works channel-major so the big output store is lane-dense over Hout*Wout.
    """
    featT = featT_ref[0]                                    # (Ch, HW)
    gate = 1.0 + gamma_ref[0]                               # (Ch, 1)
    g = _mish(featT * gate)                                 # mish(x + x*gamma)
    y = (jnp.dot(w6t_ref[...], g, preferred_element_type=jnp.float32)
         + b6_ref[...])                                     # (Cout, HW)
    o_ref[0] = jnp.dot(y, mT_ref[...],
                       preferred_element_type=jnp.float32)  # (Cout, Hout*Wout)


# ----------------------------------------------------------------------------
# wrapper
# ----------------------------------------------------------------------------
def _bilinear_matrix(l_in, l_out):
    """1-D interpolation matrix matching F.interpolate(bilinear, align_corners=False)."""
    dst = jnp.arange(l_out, dtype=jnp.float32)
    src = (dst + 0.5) * (l_in / l_out) - 0.5
    src = jnp.clip(src, 0.0, float(l_in - 1))
    i0 = jnp.clip(jnp.floor(src).astype(jnp.int32), 0, l_in - 1)
    i1 = jnp.minimum(i0 + 1, l_in - 1)
    w1 = src - i0.astype(jnp.float32)
    w0 = 1.0 - w1
    rows = jnp.arange(l_out)
    a = jnp.zeros((l_out, l_in), jnp.float32)
    a = a.at[rows, i0].add(w0)
    a = a.at[rows, i1].add(w1)
    return a


def segment_head_forward(inputs, params, scale_factor):
    x_nchw, w_arr, robust = inputs
    if isinstance(w_arr, int) and w_arr == -1:
        w_arr = []

    N, Cin, H, W = x_nchw.shape
    Ch = params["t2"].shape[1]            # head_size (32)
    Cout = params["b6"].shape[1]          # out_channels
    K = params["cw"].shape[0]             # num_codes
    HW = H * W

    cparams = pltpu.CompilerParams(dimension_semantics=("parallel",))

    # NHWC-flat layout: channels on the lane axis.
    x_flat = jnp.transpose(x_nchw, (0, 2, 3, 1)).reshape(N, HW, Cin)

    # ---- kernel A: bn1 + mish ------------------------------------------------
    act = pl.pallas_call(
        bn_act_kernel,
        out_shape=jax.ShapeDtypeStruct((N, HW, Cin), jnp.float32),
        grid_spec=pltpu.PrefetchScalarGridSpec(
            num_scalar_prefetch=0, grid=(N,),
            in_specs=[pl.BlockSpec((1, HW, Cin), lambda n: (n, 0, 0)),
                      pl.BlockSpec((1, Cin), lambda n: (0, 0)),
                      pl.BlockSpec((1, Cin), lambda n: (0, 0))],
            out_specs=pl.BlockSpec((1, HW, Cin), lambda n: (n, 0, 0))),
        compiler_params=cparams,
    )(x_flat, params["s1"], params["t1"])

    # layout plumbing in the wrapper: zero-pad AFTER the activation and build
    # the nine shifted 3x3-tap views (light im2col) for the conv kernel.
    a_pad = jnp.pad(act.reshape(N, H, W, Cin), ((0, 0), (1, 1), (1, 1), (0, 0)))
    wins = jnp.stack(
        [a_pad[:, dy:dy + H, dx:dx + W, :].reshape(N, HW, Cin)
         for dy in range(3) for dx in range(3)], axis=1)    # (N, 9, HW, Cin)

    # ---- kernel B: conv3x3 + bn2 + mish, EncModule 1x1 + norm1 + mish --------
    feat, enc_in = pl.pallas_call(
        conv_head_kernel,
        out_shape=(jax.ShapeDtypeStruct((N, HW, Ch), jnp.float32),
                   jax.ShapeDtypeStruct((N, HW, Ch), jnp.float32)),
        grid_spec=pltpu.PrefetchScalarGridSpec(
            num_scalar_prefetch=0, grid=(N,),
            in_specs=[pl.BlockSpec((1, 9, HW, Cin), lambda n: (n, 0, 0, 0)),
                      pl.BlockSpec((9, Cin, Ch), lambda n: (0, 0, 0)),
                      pl.BlockSpec((1, Ch), lambda n: (0, 0)),
                      pl.BlockSpec((Ch, Ch), lambda n: (0, 0)),
                      pl.BlockSpec((1, Ch), lambda n: (0, 0))],
            out_specs=[pl.BlockSpec((1, HW, Ch), lambda n: (n, 0, 0)),
                       pl.BlockSpec((1, HW, Ch), lambda n: (n, 0, 0))]),
        compiler_params=cparams,
    )(wins, params["w_taps"], params["t2"], params["w_enc"], params["tn1"])

    # ---- kernel C: Encoding + norm2 + mish + mean + gating / SE linears ------
    gamma, se = pl.pallas_call(
        encode_kernel,
        out_shape=(jax.ShapeDtypeStruct((N, 1, Ch), jnp.float32),
                   jax.ShapeDtypeStruct((N, 1, 2), jnp.float32)),
        grid_spec=pltpu.PrefetchScalarGridSpec(
            num_scalar_prefetch=0, grid=(N,),
            in_specs=[pl.BlockSpec((1, HW, Ch), lambda n: (n, 0, 0)),
                      pl.BlockSpec((Ch, K), lambda n: (0, 0)),    # -2*s_k * cw^T
                      pl.BlockSpec((K, Ch), lambda n: (0, 0)),    # codewords
                      pl.BlockSpec((1, K), lambda n: (0, 0)),     # s_k
                      pl.BlockSpec((1, K), lambda n: (0, 0)),     # s_k*||c_k||^2
                      pl.BlockSpec((K, 1), lambda n: (0, 0)),     # norm2 scale
                      pl.BlockSpec((K, 1), lambda n: (0, 0)),     # norm2 shift
                      pl.BlockSpec((Ch, Ch), lambda n: (0, 0)),   # linear W^T
                      pl.BlockSpec((1, Ch), lambda n: (0, 0)),    # linear b
                      pl.BlockSpec((Ch, 2), lambda n: (0, 0)),    # SE W^T
                      pl.BlockSpec((1, 2), lambda n: (0, 0))],    # SE b
            out_specs=[pl.BlockSpec((1, 1, Ch), lambda n: (n, 0, 0)),
                       pl.BlockSpec((1, 1, 2), lambda n: (n, 0, 0))]),
        compiler_params=cparams,
    )(enc_in, params["cwt_scaled"], params["cw"], params["srow"], params["sc2"],
      params["n2s"], params["n2t"], params["w_lin"], params["b_lin"],
      params["w_se"], params["b_se"])

    # bilinear upsample matrix (align_corners=False), applied on the MXU.
    if scale_factor == -1:
        Hout, Wout = H, W
        m_t = jnp.eye(HW, dtype=jnp.float32)
    else:
        Hout, Wout = H * scale_factor, W * scale_factor
        m_t = jnp.kron(_bilinear_matrix(H, Hout), _bilinear_matrix(W, Wout)).T

    # channel-major layout for the final (lane-dense) kernel.
    featT = jnp.transpose(feat, (0, 2, 1))                   # (N, Ch, HW)
    gamma_col = gamma.reshape(N, Ch, 1)                      # (N, Ch, 1)
    w6t = params["w6"].T                                     # (Cout, Ch)
    b6c = params["b6"].reshape(Cout, 1)                      # (Cout, 1)

    # ---- kernel D: gate + conv6 + bilinear upsample --------------------------
    seg = pl.pallas_call(
        gate_upsample_kernel,
        out_shape=jax.ShapeDtypeStruct((N, Cout, Hout * Wout), jnp.float32),
        grid_spec=pltpu.PrefetchScalarGridSpec(
            num_scalar_prefetch=0, grid=(N,),
            in_specs=[pl.BlockSpec((1, Ch, HW), lambda n: (n, 0, 0)),
                      pl.BlockSpec((1, Ch, 1), lambda n: (n, 0, 0)),
                      pl.BlockSpec((Cout, Ch), lambda n: (0, 0)),
                      pl.BlockSpec((Cout, 1), lambda n: (0, 0)),
                      pl.BlockSpec((HW, Hout * Wout), lambda n: (0, 0))],
            out_specs=pl.BlockSpec((1, Cout, Hout * Wout), lambda n: (n, 0, 0))),
        compiler_params=cparams,
    )(featT, gamma_col, w6t, b6c, m_t)

    seg = seg.reshape(N, Cout, Hout, Wout)                   # NCHW, like PyTorch
    se_logits = se.reshape(N, 2)
    return [[seg, se_logits], w_arr, robust]


# ----------------------------------------------------------------------------
# parameters (inference-mode BN folded into scale/shift, scales folded into weights)
# ----------------------------------------------------------------------------
def make_params(key, c_in, c_out, head=32, num_codes=32, eps=1e-5):
    keys = iter(jax.random.split(key, 16))

    def bn(k, c):
        k1, k2, k3, k4 = jax.random.split(k, 4)
        g = 1.0 + 0.1 * jax.random.normal(k1, (c,), jnp.float32)
        b = 0.1 * jax.random.normal(k2, (c,), jnp.float32)
        rm = 0.1 * jax.random.normal(k3, (c,), jnp.float32)
        rv = 0.8 + 0.2 * jnp.abs(jax.random.normal(k4, (c,), jnp.float32))
        s = g / jnp.sqrt(rv + eps)
        return s, b - rm * s

    s1, t1 = bn(next(keys), c_in)          # bn1
    s2, t2 = bn(next(keys), head)          # bn2 (after 3x3 conv)
    sn1, tn1 = bn(next(keys), head)        # EncModule.norm1
    sn2, tn2 = bn(next(keys), num_codes)   # EncModule.norm2 (BatchNorm1d over codes)

    w_hwio = 0.15 * jax.random.normal(next(keys), (3, 3, c_in, head), jnp.float32)
    w_taps = (w_hwio * s2.reshape(1, 1, 1, head)).reshape(9, c_in, head)

    w_enc = 0.15 * jax.random.normal(next(keys), (head, head), jnp.float32)
    w_enc = w_enc * sn1.reshape(1, head)                    # fold norm1 scale

    std = 1.0 / (num_codes * head) ** 0.5
    cw = jax.random.uniform(next(keys), (num_codes, head), jnp.float32, -std, std)
    scale_k = jax.random.uniform(next(keys), (num_codes,), jnp.float32, -1.0, 0.0)

    w_lin = 0.1 * jax.random.normal(next(keys), (head, head), jnp.float32)
    b_lin = 0.1 * jax.random.normal(next(keys), (head,), jnp.float32)
    w_se = 0.1 * jax.random.normal(next(keys), (head, 2), jnp.float32)
    b_se = 0.1 * jax.random.normal(next(keys), (2,), jnp.float32)
    w6 = 0.15 * jax.random.normal(next(keys), (head, c_out), jnp.float32)
    b6 = 0.1 * jax.random.normal(next(keys), (c_out,), jnp.float32)

    return {
        "s1": s1.reshape(1, c_in), "t1": t1.reshape(1, c_in),
        "w_taps": w_taps, "t2": t2.reshape(1, head),
        "w_enc": w_enc, "tn1": tn1.reshape(1, head),
        "cw": cw,
        "cwt_scaled": cw.T * (-2.0 * scale_k).reshape(1, num_codes),
        "srow": scale_k.reshape(1, num_codes),
        "sc2": (scale_k * jnp.sum(cw * cw, axis=1)).reshape(1, num_codes),
        "n2s": sn2.reshape(num_codes, 1), "n2t": tn2.reshape(num_codes, 1),
        "w_lin": w_lin, "b_lin": b_lin.reshape(1, head),
        "w_se": w_se, "b_se": b_se.reshape(1, 2),
        "w6": w6, "b6": b6.reshape(1, c_out),
    }


# ----------------------------------------------------------------------------
# pure-JAX reference (same folded parameters, independent formulation)
# ----------------------------------------------------------------------------
def segment_head_reference(x_nchw, params, scale_factor):
    N, Cin, H, W = x_nchw.shape
    Ch = params["t2"].shape[1]
    Cout = params["b6"].shape[1]
    K = params["cw"].shape[0]

    x = jnp.transpose(x_nchw, (0, 2, 3, 1))                             # NHWC
    a = _mish(x * params["s1"].reshape(1, 1, 1, Cin)
              + params["t1"].reshape(1, 1, 1, Cin))
    w_hwio = params["w_taps"].reshape(3, 3, Cin, Ch)
    feat = jax.lax.conv_general_dilated(
        a, w_hwio, (1, 1), "SAME", dimension_numbers=("NHWC", "HWIO", "NHWC"))
    feat = _mish(feat + params["t2"].reshape(1, 1, 1, Ch))
    featf = feat.reshape(N, H * W, Ch)

    enc_in = _mish(featf @ params["w_enc"] + params["tn1"])             # (N,HW,Ch)
    cw = params["cw"]
    diff = enc_in[:, :, None, :] - cw[None, None, :, :]                 # (N,HW,K,C)
    logits = params["srow"][None] * jnp.sum(diff * diff, axis=-1)       # (N,HW,K)
    aw = jax.nn.softmax(logits, axis=2)
    ef = jnp.sum(aw[..., None] * diff, axis=1)                          # (N,K,C)
    ef = _mish(ef * params["n2s"].reshape(1, K, 1)
               + params["n2t"].reshape(1, K, 1))
    enc_mean = ef.mean(axis=1)                                          # (N,C)
    gamma = _sigmoid(enc_mean @ params["w_lin"] + params["b_lin"])
    se = enc_mean @ params["w_se"] + params["b_se"]

    g = _mish(featf * (1.0 + gamma[:, None, :]))
    y = g @ params["w6"] + params["b6"]                                 # (N,HW,Cout)

    if scale_factor == -1:
        Hout, Wout = H, W
        m = jnp.eye(H * W, dtype=jnp.float32)
    else:
        Hout, Wout = H * scale_factor, W * scale_factor
        m = jnp.kron(_bilinear_matrix(H, Hout), _bilinear_matrix(W, Wout))
    out = jnp.einsum("oi,nic->noc", m, y)                               # (N,HoWo,Cout)
    seg = jnp.transpose(out, (0, 2, 1)).reshape(N, Cout, Hout, Wout)
    return seg, se


# ----------------------------------------------------------------------------
if __name__ == "__main__":
    key = jax.random.PRNGKey(0)
    kx, kp = jax.random.split(key)

    N, C_IN, H, W = 2, 16, 16, 16
    C_OUT = 8
    SCALE = 2

    x = jax.random.normal(kx, (N, C_IN, H, W), jnp.float32)
    params = make_params(kp, C_IN, C_OUT)

    out = segment_head_forward([x, -1, jnp.float32(1.0)], params, scale_factor=SCALE)
    (seg, se), w_arr, robust = out
    seg = jax.block_until_ready(seg)
    se = jax.block_until_ready(se)

    with jax.default_matmul_precision("highest"):
        ref_seg, ref_se = segment_head_reference(x, params, SCALE)
        ref_seg = jax.block_until_ready(ref_seg)

    assert seg.shape == (N, C_OUT, H * SCALE, W * SCALE)
    assert se.shape == (N, 2)
    assert jnp.allclose(seg, ref_seg, atol=1e-2, rtol=1e-2), \
        float(jnp.max(jnp.abs(seg - ref_seg)))
    assert jnp.allclose(se, ref_se, atol=1e-2, rtol=1e-2), \
        float(jnp.max(jnp.abs(se - ref_se)))

    print("KERNEL_OK")
</pallas_src>

<mosaic_0001>
module attributes {stable_mosaic.version = 11 : i64} {
  func.func @bn_act_kernel(%arg0: i32, %arg1: memref<1x256x16xf32, #tpu.memory_space<vmem>>, %arg2: memref<1x16xf32, #tpu.memory_space<vmem>>, %arg3: memref<1x16xf32, #tpu.memory_space<vmem>>, %arg4: memref<1x256x16xf32, #tpu.memory_space<vmem>>) attributes {dimension_semantics = [#tpu.dimension_semantics<parallel>], iteration_bounds = array<i64: 2>, scalar_prefetch = 0 : i64, scratch_operands = 0 : i64, tpu.core_type = #tpu.core_type<tc>, window_params = [{transform_indices = @transform_0, window_bounds = array<i64: 1, 256, 16>}, {pipeline_mode = #tpu.pipeline_mode<synchronous>, transform_indices = @transform_1, window_bounds = array<i64: 1, 16>}, {pipeline_mode = #tpu.pipeline_mode<synchronous>, transform_indices = @transform_2, window_bounds = array<i64: 1, 16>}, {transform_indices = @transform_3, window_bounds = array<i64: 1, 256, 16>}]} {
    %c0 = arith.constant 0 : index
    %c0_0 = arith.constant 0 : index
    %c0_1 = arith.constant 0 : index
    %0 = vector.load %arg1[%c0, %c0_0, %c0_1] : memref<1x256x16xf32, #tpu.memory_space<vmem>>, vector<1x256x16xf32>
    %1 = vector.shape_cast %0 : vector<1x256x16xf32> to vector<256x16xf32>
    %c0_2 = arith.constant 0 : index
    %c0_3 = arith.constant 0 : index
    %2 = vector.load %arg2[%c0_2, %c0_3] : memref<1x16xf32, #tpu.memory_space<vmem>>, vector<1x16xf32>
    %3 = vector.broadcast %2 : vector<1x16xf32> to vector<256x16xf32>
    %4 = arith.mulf %1, %3 : vector<256x16xf32>
    %c0_4 = arith.constant 0 : index
    %c0_5 = arith.constant 0 : index
    %5 = vector.load %arg3[%c0_4, %c0_5] : memref<1x16xf32, #tpu.memory_space<vmem>>, vector<1x16xf32>
    %6 = vector.broadcast %5 : vector<1x16xf32> to vector<256x16xf32>
    %7 = arith.addf %4, %6 : vector<256x16xf32>
    %cst = arith.constant 0.000000e+00 : f32
    %8 = vector.broadcast %cst : f32 to vector<256x16xf32>
    %9 = arith.maximumf %7, %8 : vector<256x16xf32>
    %10 = math.absf %7 : vector<256x16xf32>
    %cst_6 = arith.constant 0.000000e+00 : f32
    %11 = vector.broadcast %cst_6 : f32 to vector<256x16xf32>
    %12 = arith.subf %11, %10 : vector<256x16xf32>
    %13 = math.exp %12 : vector<256x16xf32>
    %cst_7 = arith.constant 1.000000e+00 : f32
    %14 = vector.broadcast %cst_7 : f32 to vector<256x16xf32>
    %15 = arith.addf %14, %13 : vector<256x16xf32>
    %16 = math.log %15 : vector<256x16xf32>
    %17 = arith.addf %9, %16 : vector<256x16xf32>
    %18 = math.tanh %17 : vector<256x16xf32>
    %19 = arith.mulf %7, %18 : vector<256x16xf32>
    %c0_8 = arith.constant 0 : index
    %c0_9 = arith.constant 0 : index
    %c0_10 = arith.constant 0 : index
    %20 = vector.load %arg4[%c0_8, %c0_9, %c0_10] : memref<1x256x16xf32, #tpu.memory_space<vmem>>, vector<1x256x16xf32>
    %21 = vector.shape_cast %20 : vector<1x256x16xf32> to vector<256x16xf32>
    %22 = vector.shape_cast %19 : vector<256x16xf32> to vector<1x256x16xf32>
    tpu.vector_store %arg4[%c0_8, %c0_9, %c0_10], %22 {strides = array<i32>} : memref<1x256x16xf32, #tpu.memory_space<vmem>>, vector<1x256x16xf32>,
    return
  }
  func.func @transform_0(%arg0: i32) -> (i32, i32, i32) {
    %c0_i32 = arith.constant 0 : i32
    %c0_i32_0 = arith.constant 0 : i32
    %c0_i32_1 = arith.constant 0 : i32
    return %arg0, %c0_i32, %c0_i32_0 : i32, i32, i32
  }
  func.func @transform_1(%arg0: i32) -> (i32, i32) {
    %c0_i32 = arith.constant 0 : i32
    %c0_i32_0 = arith.constant 0 : i32
    %c0_i32_1 = arith.constant 0 : i32
    return %c0_i32, %c0_i32_0 : i32, i32
  }
  func.func @transform_2(%arg0: i32) -> (i32, i32) {
    %c0_i32 = arith.constant 0 : i32
    %c0_i32_0 = arith.constant 0 : i32
    %c0_i32_1 = arith.constant 0 : i32
    return %c0_i32, %c0_i32_0 : i32, i32
  }
  func.func @transform_3(%arg0: i32) -> (i32, i32, i32) {
    %c0_i32 = arith.constant 0 : i32
    %c0_i32_0 = arith.constant 0 : i32
    %c0_i32_1 = arith.constant 0 : i32
    return %arg0, %c0_i32, %c0_i32_0 : i32, i32, i32
  }
}

</mosaic_0001>

<bundles_post_ra>
// kernel: tpu_custom_call.1
= control target key start
LH: loop header
LB: loop body
LE: loop exit
PB: predicated region body
PF: predicated region fallthrough
CT: control target
= control target key end

     0   :  { %s958_s12 = smov 0   ;;  %s1340_s0 = inlined_call_operand.vmem [shape: f32[2,256,16], index: 0, kind: input, shape index: {}]   ;;  %s1341_s1 = inlined_call_operand.vmem [shape: f32[1,16], index: 1, kind: input, shape index: {}]   ;;  %s1342_s2 = inlined_call_operand.vmem [shape: f32[1,16], index: 2, kind: input, shape index: {}]   ;;  %s1343_s3 = inlined_call_operand.vmem [shape: f32[2,256,16], index: 3, kind: output, shape index: {}]  }
   0x1 LB: > { %s715_s13 = sadd.s32 4294967295, %s936_s12   ;;  %p719_p0 = scmp.ge.s32.totalorder %s936_s12, 1  ;;  %s936_s12 = sphi %s958_s12, %s13_s12  }
   0x2   : > { %p137_p1 = scmp.lt.s32.totalorder %s936_s12, 3 }
   0x4   : > { %p138_p2 = pnand %p719_p0, %p137_p1 }
   0x5   : > { %p161_p3 = scmp.lt.s32.totalorder (!%p138_p2), %s715_s13, 1 }
   0x6   : > { %141 = sbr.rel (%p138_p2) target bundleno = 152 (0x98), region = 32 }
   0xb   : > { %s1345_s13 = smov (!%p161_p3, %s715_s13), 1  ;;  %v971_v0 = vld [vmem:[%s1341_s1] ss:$0 sm:$0xff]  ;;  %vm627_vm0 = vcmask 130048  }
   0xc   : > { %s726_s16 = sshll.u32 %s1345_s13, 8  ;;  %v984_v1 = vld [vmem:[%s1342_s2] ss:$0 sm:$0xff] }
   0xd   : > { %s979_s19 = scalar_lea.vmem %s1340_s0, %s726_s16  ;;  %s1112_s24 = scalar_lea.vmem %s1343_s3, %s726_s16 }
   0xe   : > { %v171_v2 = vld [vmem:[%s979_s19] sm:$0xff]  ;;  %v172_v3 = vld [vmem:[%s979_s19 + $0x8] sm:$0xff]  ;;  %v173_v4 = vld [vmem:[%s979_s19 + $0x10] sm:$0xff] }
   0xf   : > { %v207_v5 = vmul.f32 %v971_v0, %v171_v2  ;;  %v208_v6 = vmul.f32 %v971_v0, %v172_v3  ;;  %v209_v7 = vmul.f32 %v971_v0, %v173_v4  ;;  %v174_v8 = vld [vmem:[%s979_s19 + $0x18] sm:$0xff]  ;;  %v175_v9 = vld [vmem:[%s979_s19 + $0x20] sm:$0xff]  ;;  %v176_v10 = vld [vmem:[%s979_s19 + $0x28] sm:$0xff] }
  0x10   : > { %v210_v11 = vmul.f32 %v971_v0, %v174_v8  ;;  %v211_v12 = vmul.f32 %v971_v0, %v175_v9  ;;  %v212_v13 = vmul.f32 %v971_v0, %v176_v10  ;;  %v177_v14 = vld [vmem:[%s979_s19 + $0x30] sm:$0xff]  ;;  %v178_v18 = vld [vmem:[%s979_s19 + $0x38] sm:$0xff]  ;;  %v179_v41 = vld [vmem:[%s979_s19 + $0x40] sm:$0xff] }
  0x11   : > { %v1000_v15 = vadd.f32 %v984_v1, %v207_v5  ;;  %v1003_v16 = vadd.f32 %v984_v1, %v208_v6  ;;  %v1006_v17 = vadd.f32 %v984_v1, %v209_v7  ;;  %v213_v24 = vmul.f32 %v971_v0, %v177_v14  ;;  %v180_v44 = vld [vmem:[%s979_s19 + $0x48] sm:$0xff]  ;;  %v181_v45 = vld [vmem:[%s979_s19 + $0x50] sm:$0xff]  ;;  %v182_v52 = vld [vmem:[%s979_s19 + $0x58] sm:$0xff] }
  0x12   : > { %v1010_v19 = vadd.f32 %v984_v1, %v210_v11  ;;  %v1013_v20 = vadd.f32 %v984_v1, %v211_v12  ;;  %v1016_v21 = vadd.f32 %v984_v1, %v212_v13  ;;  %v214_v26 = vmul.f32 %v971_v0, %v178_v18 }
  0x13   : > { %v307_v22 = vand.u32 2147483647, %v1000_v15  ;;  %v308_v23 = vand.u32 2147483647, %v1003_v16  ;;  %v309_v25 = vand.u32 2147483647, %v1006_v17  ;;  %v1027_v36 = vadd.f32 %v984_v1, %v213_v24 }
  0x14   : > { %v310_v29 = vand.u32 2147483647, %v1010_v19  ;;  %v311_v31 = vand.u32 2147483647, %v1013_v20  ;;  %v312_v32 = vand.u32 2147483647, %v1016_v21  ;;  %v1030_v40 = vadd.f32 %v984_v1, %v214_v26 }
  0x15   : > { %v339_v27 = vsub.f32 0.0, %v307_v22  ;;  %v340_v28 = vsub.f32 0.0, %v308_v23  ;;  %v341_v30 = vsub.f32 0.0, %v309_v25  ;;  %v313_v43 = vand.u32 2147483647, %v1027_v36  ;;  %v183_v23 = vld [vmem:[%s979_s19 + $0x60] sm:$0xff] }
  0x16   : > { %v342_v35 = vsub.f32 0.0, %v310_v29  ;;  %v343_v38 = vsub.f32 0.0, %v311_v31  ;;  %v344_v39 = vsub.f32 0.0, %v312_v32  ;;  %v275_v46 = vmax.f32 %v1000_v15, 0.0 }
  0x17   : > { %v371_v33 = vmul.f32 1.442695, %v339_v27  ;;  %v373_v34 = vmul.f32 1.442695, %v340_v28  ;;  %v375_v37 = vmul.f32 1.442695, %v341_v30  ;;  %v215_v51 = vmul.f32 %v971_v0, %v179_v41 }
  0x18   : > { %v377_v42 = vmul.f32 1.442695, %v342_v35  ;;  %v379_v47 = vmul.f32 1.442695, %v343_v38  ;;  %v381_v48 = vmul.f32 1.442695, %v344_v39  ;;  %v216_v54 = vmul.f32 %v971_v0, %v180_v44 }
  0x19   : > { %738 = vpow2.f32 %v371_v33  ;;  %v345_v49 = vsub.f32 0.0, %v313_v43  ;;  %v314_v50 = vand.u32 2147483647, %v1030_v40  ;;  %v276_v53 = vmax.f32 %v1003_v16, 0.0  ;;  %v184_v28 = vld [vmem:[%s979_s19 + $0x68] sm:$0xff] }
  0x1a   : > { %740 = vpow2.f32 %v373_v34  ;;  %v217_v55 = vmul.f32 %v971_v0, %v181_v45  ;;  %v1044_v58 = vadd.f32 %v984_v1, %v215_v51  ;;  %v1047_v59 = vadd.f32 %v984_v1, %v216_v54 }
  0x1b   : > { %742 = vpow2.f32 %v375_v37  ;;  %v383_v56 = vmul.f32 1.442695, %v345_v49  ;;  %v346_v57 = vsub.f32 0.0, %v314_v50  ;;  %v218_v61 = vmul.f32 %v971_v0, %v182_v52 }
  0x1c   : > { %744 = vpow2.f32 %v377_v42  ;;  %v1050_v60 = vadd.f32 %v984_v1, %v217_v55  ;;  %v277_v63 = vmax.f32 %v1006_v17, 0.0  ;;  %v315_v3 = vand.u32 2147483647, %v1044_v58  ;;  %v185_v42 = vld [vmem:[%s979_s19 + $0x70] sm:$0xff] }
  0x1d   : > { %746 = vpow2.f32 %v379_v47  ;;  %v385_v2 = vmul.f32 1.442695, %v346_v57  ;;  %v278_v6 = vmax.f32 %v1010_v19, 0.0  ;;  %v279_v7 = vmax.f32 %v1013_v20, 0.0 }
  0x1e   : > { %748 = vpow2.f32 %v381_v48  ;;  %v316_v8 = vand.u32 2147483647, %v1047_v59  ;;  %v347_v11 = vsub.f32 0.0, %v315_v3  ;;  %v317_v12 = vand.u32 2147483647, %v1050_v60  ;;  %v186_v48 = vld [vmem:[%s979_s19 + $0x78] sm:$0xff] }
  0x1f   : > { %v739_v62 = vpop.eup %738  ;;  %750 = vpow2.f32 %v383_v56  ;;  %v280_v18 = vmax.f32 %v1016_v21, 0.0  ;;  %v1061_v22 = vadd.f32 %v984_v1, %v218_v61  ;;  %v281_v26 = vmax.f32 %v1027_v36, 0.0 }
  0x20   : > { %v741_v4 = vpop.eup %740  ;;  %v435_v5 = vadd.f32 1.0, %v739_v62  ;;  %752 = vpow2.f32 %v385_v2  ;;  %v348_v27 = vsub.f32 0.0, %v316_v8  ;;  %v282_v31 = vmax.f32 %v1030_v40, 0.0 }
  0x21   : > { %v743_v9 = vpop.eup %742  ;;  %v436_v10 = vadd.f32 1.0, %v741_v4  ;;  %v349_v32 = vsub.f32 0.0, %v317_v12  ;;  %v387_v35 = vmul.f32 1.442695, %v347_v11  ;;  %v219_v37 = vmul.f32 %v971_v0, %v183_v23 }
  0x22   : > { %v745_v13 = vpop.eup %744  ;;  %754 = vlog2.f32 %v435_v5  ;;  %v437_v14 = vadd.f32 1.0, %v743_v9  ;;  %v318_v39 = vand.u32 2147483647, %v1061_v22  ;;  %v220_v41 = vmul.f32 %v971_v0, %v184_v28 }
  0x23   : > { %v747_v24 = vpop.eup %746  ;;  %756 = vlog2.f32 %v436_v10  ;;  %v438_v25 = vadd.f32 1.0, %v745_v13  ;;  %v283_v44 = vmax.f32 %v1044_v58, 0.0  ;;  %v389_v45 = vmul.f32 1.442695, %v348_v27 }
  0x24   : > { %v749_v29 = vpop.eup %748  ;;  %758 = vlog2.f32 %v437_v14  ;;  %v439_v30 = vadd.f32 1.0, %v747_v24  ;;  %v1073_v47 = vadd.f32 %v984_v1, %v219_v37  ;;  %v391_v51 = vmul.f32 1.442695, %v349_v32 }
  0x25   : > { %v751_v33 = vpop.eup %750  ;;  %760 = vlog2.f32 %v438_v25  ;;  %v440_v34 = vadd.f32 1.0, %v749_v29  ;;  %v1077_v52 = vadd.f32 %v984_v1, %v220_v41  ;;  %v284_v56 = vmax.f32 %v1047_v59, 0.0 }
  0x26   : > { %762 = vlog2.f32 %v439_v30  ;;  %v441_v38 = vadd.f32 1.0, %v751_v33  ;;  %v753_v43 = vpop.eup %752  ;;  %v221_v57 = vmul.f32 %v971_v0, %v185_v42  ;;  %v350_v2 = vsub.f32 0.0, %v318_v39 }
  0x27   : > { %764 = vlog2.f32 %v440_v34  ;;  %v442_v50 = vadd.f32 1.0, %v753_v43  ;;  %v222_v3 = vmul.f32 %v971_v0, %v186_v48  ;;  %v319_v9 = vand.u32 2147483647, %v1073_v47  ;;  %v187_v34 = vld [vmem:[%s979_s19 + $0x80] sm:$0xff] }
  0x28   : > { %v755_v49 = vpop.eup %754  ;;  %766 = vlog2.f32 %v441_v38  ;;  %v320_v13 = vand.u32 2147483647, %v1077_v52  ;;  %v1091_v24 = vadd.f32 %v984_v1, %v221_v57  ;;  %v393_v28 = vmul.f32 1.442695, %v350_v2 }
  0x29   : > { %v757_v54 = vpop.eup %756  ;;  %v468_v55 = vmul.f32 0.6931472, %v755_v49  ;;  %768 = vpow2.f32 %v387_v35  ;;  %v351_v33 = vsub.f32 0.0, %v319_v9  ;;  %v223_v48 = vmul.f32 %v971_v0, %v187_v34  ;;  %v189_v9 = vld [vmem:[%s979_s19 + $0x90] sm:$0xff] }
  0x2a   : > { %v759_v61 = vpop.eup %758  ;;  %v470_v62 = vmul.f32 0.6931472, %v757_v54  ;;  %770 = vlog2.f32 %v442_v50  ;;  %v352_v38 = vsub.f32 0.0, %v320_v13 }
  0x2b   : > { %v761_v4 = vpop.eup %760  ;;  %v531_v5 = vadd.f32 %v468_v55, %v275_v46  ;;  %v472_v8 = vmul.f32 0.6931472, %v759_v61  ;;  %772 = vpow2.f32 %v389_v45  ;;  %v1104_v45 = vadd.f32 %v984_v1, %v222_v3 }
  0x2c   : > { %v763_v10 = vpop.eup %762  ;;  %v532_v11 = vadd.f32 %v470_v62, %v276_v53  ;;  %v474_v12 = vmul.f32 0.6931472, %v761_v4  ;;  %774 = vpow2.f32 %v391_v51  ;;  %v188_v51 = vld [vmem:[%s979_s19 + $0x88] sm:$0xff]  ;;  %v395_v57 = vmul.f32 1.442695, %v351_v33 }
  0x2d   : > { %v765_v14 = vpop.eup %764  ;;  %776 = vtanh.f32 %v531_v5  ;;  %v533_v23 = vadd.f32 %v472_v8, %v277_v63  ;;  %v476_v46 = vmul.f32 0.6931472, %v763_v10  ;;  %v322_v61 = vand.u32 2147483647, %v1104_v45 }
  0x2e   : > { %v767_v25 = vpop.eup %766  ;;  %778 = vtanh.f32 %v532_v11  ;;  %v534_v27 = vadd.f32 %v474_v12, %v278_v6  ;;  %v478_v53 = vmul.f32 0.6931472, %v765_v14  ;;  %v397_v3 = vmul.f32 1.442695, %v352_v38 }
  0x2f   : > { %v769_v29 = vpop.eup %768  ;;  %780 = vtanh.f32 %v533_v23  ;;  %v535_v30 = vadd.f32 %v476_v46, %v279_v7  ;;  %v480_v32 = vmul.f32 0.6931472, %v767_v25  ;;  %v321_v7 = vand.u32 2147483647, %v1091_v24 }
  0x30   : > { %v771_v63 = vpop.eup %770  ;;  %782 = vtanh.f32 %v534_v27  ;;  %v536_v35 = vadd.f32 %v478_v53, %v280_v18  ;;  %v443_v37 = vadd.f32 1.0, %v769_v29  ;;  %v224_v8 = vmul.f32 %v971_v0, %v188_v51  ;;  %v190_v53 = vld [vmem:[%s979_s19 + $0x98] sm:$0xff]  ;;  %v192_v51 = vld [vmem:[%s979_s19 + $0xa8] sm:$0xff] }
  0x31   : > { %v773_v39 = vpop.eup %772  ;;  %784 = vtanh.f32 %v535_v30  ;;  %v537_v6 = vadd.f32 %v480_v32, %v281_v26  ;;  %v482_v41 = vmul.f32 0.6931472, %v771_v63  ;;  %v353_v50 = vsub.f32 0.0, %v321_v7  ;;  %v191_v63 = vld [vmem:[%s979_s19 + $0xa0] sm:$0xff] }
  0x32   : > { %v775_v42 = vpop.eup %774  ;;  %786 = vtanh.f32 %v536_v35  ;;  %v444_v43 = vadd.f32 1.0, %v773_v39  ;;  %v1136_v23 = vadd.f32 %v984_v1, %v224_v8  ;;  %v225_v27 = vmul.f32 %v971_v0, %v189_v9  ;;  %v193_v9 = vld [vmem:[%s979_s19 + $0xb0] sm:$0xff] }
  0x33   : > { %v777_v18 = vpop.eup %776  ;;  %788 = vtanh.f32 %v537_v6  ;;  %v538_v26 = vadd.f32 %v482_v41, %v282_v31  ;;  %v445_v49 = vadd.f32 1.0, %v775_v42  ;;  %v1121_v31 = vadd.f32 %v984_v1, %v223_v48 }
  0x34   : > { %v779_v54 = vpop.eup %778  ;;  %v595_v55 = vmul.f32 %v777_v18, %v1000_v15  ;;  %790 = vlog2.f32 %v443_v37  ;;  %v354_v15 = vsub.f32 0.0, %v322_v61  ;;  %v399_v11 = vmul.f32 1.442695, %v353_v50 }
  0x35   : > { %v781_v62 = vpop.eup %780  ;;  %v596_v2 = vmul.f32 %v779_v54, %v1003_v16  ;;  %792 = vtanh.f32 %v538_v26  ;;  %v323_v12 = vand.u32 2147483647, %v1121_v31  ;;  %v324_v30 = vand.u32 2147483647, %v1136_v23 }
  0x36   : > { %v783_v4 = vpop.eup %782  ;;  %628 = vst.msk [vmem:[%s1112_s24] sm:$0xff] %vm627_vm0, %v595_v55  ;;  %v597_v5 = vmul.f32 %v781_v62, %v1006_v17  ;;  %794 = vlog2.f32 %v444_v43  ;;  %v401_v14 = vmul.f32 1.442695, %v354_v15  ;;  %v1151_v34 = vadd.f32 %v984_v1, %v225_v27 }
  0x37   : > { %v785_v10 = vpop.eup %784  ;;  %629 = vst.msk [vmem:[%s1112_s24 + $0x8] sm:$0xff] %vm627_vm0, %v596_v2  ;;  %v598_v16 = vmul.f32 %v783_v4, %v1010_v19  ;;  %796 = vlog2.f32 %v445_v49  ;;  %v355_v25 = vsub.f32 0.0, %v323_v12  ;;  %v356_v37 = vsub.f32 0.0, %v324_v30 }
  0x38   : > { %v787_v13 = vpop.eup %786  ;;  %630 = vst.msk [vmem:[%s1112_s24 + $0x10] sm:$0xff] %vm627_vm0, %v597_v5  ;;  %v599_v17 = vmul.f32 %v785_v10, %v1013_v20  ;;  %798 = vpow2.f32 %v393_v28  ;;  %v285_v28 = vmax.f32 %v1050_v60, 0.0  ;;  %v226_v38 = vmul.f32 %v971_v0, %v190_v53 }
  0x39   : > { %v789_v46 = vpop.eup %788  ;;  %631 = vst.msk [vmem:[%s1112_s24 + $0x18] sm:$0xff] %vm627_vm0, %v598_v16  ;;  %v600_v19 = vmul.f32 %v787_v13, %v1016_v21  ;;  %800 = vpow2.f32 %v395_v57  ;;  %v403_v33 = vmul.f32 1.442695, %v355_v25  ;;  %v286_v7 = vmax.f32 %v1061_v22, 0.0  ;;  %v194_v13 = vld [vmem:[%s979_s19 + $0xb8] sm:$0xff] }
  0x3a   : > { %v791_v29 = vpop.eup %790  ;;  %632 = vst.msk [vmem:[%s1112_s24 + $0x20] sm:$0xff] %vm627_vm0, %v599_v17  ;;  %v601_v20 = vmul.f32 %v789_v46, %v1027_v36  ;;  %802 = vpow2.f32 %v397_v3  ;;  %v405_v48 = vmul.f32 1.442695, %v356_v37  ;;  %v227_v18 = vmul.f32 %v971_v0, %v191_v63 }
  0x3b   : > { %v793_v32 = vpop.eup %792  ;;  %633 = vst.msk [vmem:[%s1112_s24 + $0x28] sm:$0xff] %vm627_vm0, %v600_v19  ;;  %v484_v21 = vmul.f32 0.6931472, %v791_v29  ;;  %804 = vpow2.f32 %v399_v11  ;;  %v325_v50 = vand.u32 2147483647, %v1151_v34  ;;  %v287_v57 = vmax.f32 %v1073_v47, 0.0 }
  0x3c   : > { %v795_v35 = vpop.eup %794  ;;  %634 = vst.msk [vmem:[%s1112_s24 + $0x30] sm:$0xff] %vm627_vm0, %v601_v20  ;;  %v602_v36 = vmul.f32 %v793_v32, %v1030_v40  ;;  %806 = vpow2.f32 %v401_v14  ;;  %v1164_v40 = vadd.f32 %v984_v1, %v226_v38  ;;  %v1174_v15 = vadd.f32 %v984_v1, %v227_v18 }
  0x3d   : > { %v797_v39 = vpop.eup %796  ;;  %v539_v6 = vadd.f32 %v484_v21, %v283_v44  ;;  %v486_v41 = vmul.f32 0.6931472, %v795_v35  ;;  %808 = vpow2.f32 %v403_v33  ;;  %v357_v3 = vsub.f32 0.0, %v325_v50 }
  0x3e   : > { %v799_v42 = vpop.eup %798  ;;  %635 = vst.msk [vmem:[%s1112_s24 + $0x38] sm:$0xff] %vm627_vm0, %v602_v36  ;;  %v488_v43 = vmul.f32 0.6931472, %v797_v39  ;;  %v326_v4 = vand.u32 2147483647, %v1164_v40  ;;  %v228_v8 = vmul.f32 %v971_v0, %v192_v51  ;;  %v288_v16 = vmax.f32 %v1077_v52, 0.0 }
  0x3f   : > { %v801_v26 = vpop.eup %800  ;;  %810 = vtanh.f32 %v539_v6  ;;  %v540_v49 = vadd.f32 %v486_v41, %v284_v56  ;;  %v446_v44 = vadd.f32 1.0, %v799_v42  ;;  %v289_v17 = vmax.f32 %v1091_v24, 0.0 }
  0x40   : > { %v803_v54 = vpop.eup %802  ;;  %v541_v55 = vadd.f32 %v488_v43, %v285_v28  ;;  %v447_v61 = vadd.f32 1.0, %v801_v26  ;;  %812 = vpow2.f32 %v405_v48  ;;  %v358_v12 = vsub.f32 0.0, %v326_v4 }
  0x41   : > { %v805_v62 = vpop.eup %804  ;;  %814 = vtanh.f32 %v540_v49  ;;  %v448_v2 = vadd.f32 1.0, %v803_v54  ;;  %v327_v46 = vand.u32 2147483647, %v1174_v15  ;;  %v407_v25 = vmul.f32 1.442695, %v357_v3  ;;  %v195_v3 = vld [vmem:[%s979_s19 + $0xc0] sm:$0xff] }
  0x42   : > { %v807_v5 = vpop.eup %806  ;;  %816 = vtanh.f32 %v541_v55  ;;  %v449_v56 = vadd.f32 1.0, %v805_v62  ;;  %v1183_v27 = vadd.f32 %v984_v1, %v228_v8  ;;  %v229_v53 = vmul.f32 %v971_v0, %v193_v9 }
  0x43   : > { %v809_v10 = vpop.eup %808  ;;  %818 = vlog2.f32 %v446_v44  ;;  %v450_v11 = vadd.f32 1.0, %v807_v5  ;;  %v359_v28 = vsub.f32 0.0, %v327_v46  ;;  %v230_v30 = vmul.f32 %v971_v0, %v194_v13  ;;  %v196_v46 = vld [vmem:[%s979_s19 + $0xc8] sm:$0xff] }
  0x44   : > { %820 = vlog2.f32 %v447_v61  ;;  %v451_v14 = vadd.f32 1.0, %v809_v10  ;;  %v409_v33 = vmul.f32 1.442695, %v358_v12  ;;  %v328_v63 = vand.u32 2147483647, %v1183_v27 }
  0x45   : > { %v811_v19 = vpop.eup %810  ;;  %822 = vlog2.f32 %v448_v2  ;;  %v411_v37 = vmul.f32 1.442695, %v359_v28  ;;  %v1197_v41 = vadd.f32 %v984_v1, %v230_v30 }
  0x46   : > { %v813_v29 = vpop.eup %812  ;;  %v603_v20 = vmul.f32 %v811_v19, %v1044_v58  ;;  %824 = vlog2.f32 %v449_v56  ;;  %v1193_v58 = vadd.f32 %v984_v1, %v229_v53  ;;  %v360_v6 = vsub.f32 0.0, %v328_v63  ;;  %v197_v19 = vld [vmem:[%s979_s19 + $0xd0] sm:$0xff] }
  0x47   : > { %v815_v32 = vpop.eup %814  ;;  %826 = vlog2.f32 %v450_v11  ;;  %v452_v21 = vadd.f32 1.0, %v813_v29  ;;  %v330_v2 = vand.u32 2147483647, %v1197_v41  ;;  %v233_v63 = vmul.f32 %v971_v0, %v197_v19 }
  0x48   : > { %v817_v35 = vpop.eup %816  ;;  %636 = vst.msk [vmem:[%s1112_s24 + $0x40] sm:$0xff] %vm627_vm0, %v603_v20  ;;  %v604_v36 = vmul.f32 %v815_v32, %v1047_v59  ;;  %828 = vlog2.f32 %v451_v14  ;;  %v290_v59 = vmax.f32 %v1104_v45, 0.0  ;;  %v329_v48 = vand.u32 2147483647, %v1193_v58 }
  0x49   : > { %v819_v38 = vpop.eup %818  ;;  %v605_v39 = vmul.f32 %v817_v35, %v1050_v60  ;;  %830 = vlog2.f32 %v452_v21  ;;  %v291_v60 = vmax.f32 %v1121_v31, 0.0  ;;  %v413_v49 = vmul.f32 1.442695, %v360_v6  ;;  %v198_v35 = vld [vmem:[%s979_s19 + $0xd8] sm:$0xff] }
  0x4a   : > { %v821_v42 = vpop.eup %820  ;;  %637 = vst.msk [vmem:[%s1112_s24 + $0x48] sm:$0xff] %vm627_vm0, %v604_v36  ;;  %v490_v43 = vmul.f32 0.6931472, %v819_v38  ;;  %832 = vpow2.f32 %v407_v25  ;;  %v361_v54 = vsub.f32 0.0, %v329_v48  ;;  %v362_v11 = vsub.f32 0.0, %v330_v2 }
  0x4b   : > { %v823_v18 = vpop.eup %822  ;;  %638 = vst.msk [vmem:[%s1112_s24 + $0x50] sm:$0xff] %vm627_vm0, %v605_v39  ;;  %v492_v26 = vmul.f32 0.6931472, %v821_v42  ;;  %834 = vpow2.f32 %v409_v33  ;;  %v231_v14 = vmul.f32 %v971_v0, %v195_v3  ;;  %v232_v33 = vmul.f32 %v971_v0, %v196_v46 }
  0x4c   : > { %v825_v44 = vpop.eup %824  ;;  %v542_v50 = vadd.f32 %v490_v43, %v286_v7  ;;  %v494_v51 = vmul.f32 0.6931472, %v823_v18  ;;  %836 = vpow2.f32 %v411_v37  ;;  %v292_v7 = vmax.f32 %v1136_v23, 0.0 }
  0x4d   : > { %v827_v55 = vpop.eup %826  ;;  %v543_v61 = vadd.f32 %v492_v26, %v287_v57  ;;  %v496_v62 = vmul.f32 0.6931472, %v825_v44  ;;  %838 = vpow2.f32 %v413_v49  ;;  %v415_v29 = vmul.f32 1.442695, %v361_v54 }
  0x4e   : > { %v829_v4 = vpop.eup %828  ;;  %840 = vtanh.f32 %v542_v50  ;;  %v544_v5 = vadd.f32 %v494_v51, %v288_v16  ;;  %v498_v56 = vmul.f32 0.6931472, %v827_v55  ;;  %v1217_v30 = vadd.f32 %v984_v1, %v231_v14  ;;  %v199_v51 = vld [vmem:[%s979_s19 + $0xe0] sm:$0xff] }
  0x4f   : > { %v831_v8 = vpop.eup %830  ;;  %842 = vtanh.f32 %v543_v61  ;;  %v545_v9 = vadd.f32 %v496_v62, %v289_v17  ;;  %v500_v10 = vmul.f32 0.6931472, %v829_v4  ;;  %v417_v38 = vmul.f32 1.442695, %v362_v11 }
  0x50   : > { %v833_v12 = vpop.eup %832  ;;  %844 = vtanh.f32 %v544_v5  ;;  %v546_v57 = vadd.f32 %v498_v56, %v290_v59  ;;  %v502_v13 = vmul.f32 0.6931472, %v831_v8  ;;  %v331_v39 = vand.u32 2147483647, %v1217_v30 }
  0x51   : > { %v835_v25 = vpop.eup %834  ;;  %846 = vtanh.f32 %v545_v9  ;;  %v547_v16 = vadd.f32 %v500_v10, %v291_v60  ;;  %v453_v53 = vadd.f32 1.0, %v833_v12  ;;  %v1225_v43 = vadd.f32 %v984_v1, %v232_v33  ;;  %v200_v10 = vld [vmem:[%s979_s19 + $0xe8] sm:$0xff] }
  0x52   : > { %v837_v20 = vpop.eup %836  ;;  %848 = vtanh.f32 %v546_v57  ;;  %v548_v28 = vadd.f32 %v502_v13, %v292_v7  ;;  %v454_v17 = vadd.f32 1.0, %v835_v25  ;;  %v1228_v59 = vadd.f32 %v984_v1, %v233_v63 }
  0x53   : > { %v839_v32 = vpop.eup %838  ;;  %850 = vtanh.f32 %v547_v16  ;;  %v455_v21 = vadd.f32 1.0, %v837_v20  ;;  %v363_v26 = vsub.f32 0.0, %v331_v39  ;;  %v234_v60 = vmul.f32 %v971_v0, %v198_v35 }
  0x54   : > { %v841_v36 = vpop.eup %840  ;;  %852 = vtanh.f32 %v548_v28  ;;  %v456_v37 = vadd.f32 1.0, %v839_v32  ;;  %v293_v44 = vmax.f32 %v1151_v34, 0.0  ;;  %v332_v50 = vand.u32 2147483647, %v1225_v43 }
  0x55   : > { %v843_v6 = vpop.eup %842  ;;  %v606_v42 = vmul.f32 %v841_v36, %v1061_v22  ;;  %854 = vlog2.f32 %v453_v53  ;;  %v294_v55 = vmax.f32 %v1164_v40, 0.0  ;;  %v419_v61 = vmul.f32 1.442695, %v363_v26 }
  0x56   : > { %v845_v48 = vpop.eup %844  ;;  %v607_v18 = vmul.f32 %v843_v6, %v1073_v47  ;;  %856 = vlog2.f32 %v454_v17  ;;  %v364_v2 = vsub.f32 0.0, %v332_v50  ;;  %v333_v3 = vand.u32 2147483647, %v1228_v59 }
  0x57   : > { %v847_v49 = vpop.eup %846  ;;  %639 = vst.msk [vmem:[%s1112_s24 + $0x58] sm:$0xff] %vm627_vm0, %v606_v42  ;;  %v608_v22 = vmul.f32 %v845_v48, %v1077_v52  ;;  %858 = vlog2.f32 %v455_v21  ;;  %v1250_v5 = vadd.f32 %v984_v1, %v234_v60  ;;  %v235_v56 = vmul.f32 %v971_v0, %v199_v51  ;;  %v201_v21 = vld [vmem:[%s979_s19 + $0xf0] sm:$0xff]  ;;  %v202_v42 = vld [vmem:[%s979_s19 + $0xf8] sm:$0xff] }
  0x58   : > { %v849_v54 = vpop.eup %848  ;;  %640 = vst.msk [vmem:[%s1112_s24 + $0x60] sm:$0xff] %vm627_vm0, %v607_v18  ;;  %v609_v47 = vmul.f32 %v847_v49, %v1091_v24  ;;  %860 = vlog2.f32 %v456_v37  ;;  %v421_v8 = vmul.f32 1.442695, %v364_v2  ;;  %v365_v9 = vsub.f32 0.0, %v333_v3 }
  0x59   : > { %v851_v62 = vpop.eup %850  ;;  %641 = vst.msk [vmem:[%s1112_s24 + $0x68] sm:$0xff] %vm627_vm0, %v608_v22  ;;  %v610_v52 = vmul.f32 %v849_v54, %v1104_v45  ;;  %862 = vpow2.f32 %v415_v29  ;;  %v295_v12 = vmax.f32 %v1174_v15, 0.0  ;;  %v334_v57 = vand.u32 2147483647, %v1250_v5 }
  0x5a   : > { %v853_v4 = vpop.eup %852  ;;  %642 = vst.msk [vmem:[%s1112_s24 + $0x70] sm:$0xff] %vm627_vm0, %v609_v47  ;;  %v611_v24 = vmul.f32 %v851_v62, %v1121_v31  ;;  %864 = vpow2.f32 %v417_v38  ;;  %v1262_v13 = vadd.f32 %v984_v1, %v235_v56  ;;  %v296_v46 = vmax.f32 %v1183_v27, 0.0 }
  0x5b   : > { %v855_v7 = vpop.eup %854  ;;  %643 = vst.msk [vmem:[%s1112_s24 + $0x78] sm:$0xff] %vm627_vm0, %v610_v52  ;;  %v612_v45 = vmul.f32 %v853_v4, %v1136_v23  ;;  %866 = vpow2.f32 %v419_v61  ;;  %v423_v19 = vmul.f32 1.442695, %v365_v9  ;;  %v236_v29 = vmul.f32 %v971_v0, %v200_v10 }
  0x5c   : > { %v857_v11 = vpop.eup %856  ;;  %644 = vst.msk [vmem:[%s1112_s24 + $0x80] sm:$0xff] %vm627_vm0, %v611_v24  ;;  %v504_v31 = vmul.f32 0.6931472, %v855_v7  ;;  %868 = vpow2.f32 %v421_v8  ;;  %v335_v32 = vand.u32 2147483647, %v1262_v13  ;;  %v366_v36 = vsub.f32 0.0, %v334_v57 }
  0x5d   : > { %v859_v14 = vpop.eup %858  ;;  %645 = vst.msk [vmem:[%s1112_s24 + $0x88] sm:$0xff] %vm627_vm0, %v612_v45  ;;  %v506_v23 = vmul.f32 0.6931472, %v857_v11  ;;  %870 = vpow2.f32 %v423_v19  ;;  %v1272_v18 = vadd.f32 %v984_v1, %v236_v29  ;;  %v237_v26 = vmul.f32 %v971_v0, %v201_v21 }
  0x5e   : > { %v861_v25 = vpop.eup %860  ;;  %v549_v16 = vadd.f32 %v504_v31, %v293_v44  ;;  %v508_v53 = vmul.f32 0.6931472, %v859_v14  ;;  %v367_v6 = vsub.f32 0.0, %v335_v32  ;;  %v238_v44 = vmul.f32 %v971_v0, %v202_v42 }
  0x5f   : > { %v863_v20 = vpop.eup %862  ;;  %v550_v28 = vadd.f32 %v506_v23, %v294_v55  ;;  %v510_v17 = vmul.f32 0.6931472, %v861_v25  ;;  %v336_v22 = vand.u32 2147483647, %v1272_v18  ;;  %v425_v51 = vmul.f32 1.442695, %v366_v36 }
  0x60   : > { %v865_v33 = vpop.eup %864  ;;  %872 = vtanh.f32 %v549_v16  ;;  %v551_v63 = vadd.f32 %v508_v53, %v295_v12  ;;  %v457_v35 = vadd.f32 1.0, %v863_v20  ;;  %v1278_v54 = vadd.f32 %v984_v1, %v237_v26 }
  0x61   : > { %v867_v37 = vpop.eup %866  ;;  %874 = vtanh.f32 %v550_v28  ;;  %v552_v38 = vadd.f32 %v510_v17, %v296_v46  ;;  %v458_v39 = vadd.f32 1.0, %v865_v33  ;;  %v427_v61 = vmul.f32 1.442695, %v367_v6 }
  0x62   : > { %876 = vtanh.f32 %v551_v63  ;;  %v459_v48 = vadd.f32 1.0, %v867_v37  ;;  %v869_v60 = vpop.eup %868  ;;  %v368_v62 = vsub.f32 0.0, %v336_v22  ;;  %v337_v3 = vand.u32 2147483647, %v1278_v54 }
  0x63   : > { %878 = vtanh.f32 %v552_v38  ;;  %v460_v49 = vadd.f32 1.0, %v869_v60  ;;  %v871_v50 = vpop.eup %870  ;;  %v1284_v56 = vadd.f32 %v984_v1, %v238_v44  ;;  %v298_v10 = vmax.f32 %v1197_v41, 0.0 }
  0x64   : > { %880 = vlog2.f32 %v457_v35  ;;  %v461_v55 = vadd.f32 1.0, %v871_v50  ;;  %v429_v24 = vmul.f32 1.442695, %v368_v62  ;;  %v369_v8 = vsub.f32 0.0, %v337_v3 }
  0x65   : > { %882 = vlog2.f32 %v458_v39  ;;  %v299_v31 = vmax.f32 %v1217_v30, 0.0  ;;  %v300_v14 = vmax.f32 %v1225_v43, 0.0  ;;  %v338_v23 = vand.u32 2147483647, %v1284_v56 }
  0x66   : > { %v873_v47 = vpop.eup %872  ;;  %884 = vlog2.f32 %v459_v48  ;;  %v301_v25 = vmax.f32 %v1228_v59, 0.0 }
  0x67   : > { %v875_v52 = vpop.eup %874  ;;  %v613_v2 = vmul.f32 %v873_v47, %v1151_v34  ;;  %886 = vlog2.f32 %v460_v49  ;;  %v297_v34 = vmax.f32 %v1193_v58, 0.0  ;;  %v370_v63 = vsub.f32 0.0, %v338_v23 }
  0x68   : > { %v877_v0 = vpop.eup %876  ;;  %v614_v4 = vmul.f32 %v875_v52, %v1164_v40  ;;  %888 = vlog2.f32 %v461_v55 }
  0x69   : > { %v879_v7 = vpop.eup %878  ;;  %646 = vst.msk [vmem:[%s1112_s24 + $0x90] sm:$0xff] %vm627_vm0, %v613_v2  ;;  %v615_v45 = vmul.f32 %v877_v0, %v1174_v15  ;;  %890 = vpow2.f32 %v425_v51  ;;  %v431_v15 = vmul.f32 1.442695, %v369_v8  ;;  %v433_v42 = vmul.f32 1.442695, %v370_v63 }
  0x6a   : > { %v881_v9 = vpop.eup %880  ;;  %647 = vst.msk [vmem:[%s1112_s24 + $0x98] sm:$0xff] %vm627_vm0, %v614_v4  ;;  %v616_v40 = vmul.f32 %v879_v7, %v1183_v27  ;;  %892 = vpow2.f32 %v427_v61  ;;  %v303_v61 = vmax.f32 %v1262_v13, 0.0 }
  0x6b   : > { %v883_v1 = vpop.eup %882  ;;  %648 = vst.msk [vmem:[%s1112_s24 + $0xa0] sm:$0xff] %vm627_vm0, %v615_v45  ;;  %v512_v11 = vmul.f32 0.6931472, %v881_v9  ;;  %894 = vpow2.f32 %v429_v24 }
  0x6c   : > { %v885_v12 = vpop.eup %884  ;;  %649 = vst.msk [vmem:[%s1112_s24 + $0xa8] sm:$0xff] %vm627_vm0, %v616_v40  ;;  %v514_v57 = vmul.f32 0.6931472, %v883_v1  ;;  %896 = vpow2.f32 %v431_v15 }
  0x6d   : > { %v887_v27 = vpop.eup %886  ;;  %v553_v46 = vadd.f32 %v512_v11, %v297_v34  ;;  %v516_v19 = vmul.f32 0.6931472, %v885_v12 }
  0x6e   : > { %v889_v16 = vpop.eup %888  ;;  %v554_v53 = vadd.f32 %v514_v57, %v298_v10  ;;  %v518_v29 = vmul.f32 0.6931472, %v887_v27  ;;  %v306_v57 = vmax.f32 %v1284_v56, 0.0 }
  0x6f   : > { %v891_v20 = vpop.eup %890  ;;  %898 = vtanh.f32 %v553_v46  ;;  %v555_v28 = vadd.f32 %v516_v19, %v299_v31  ;;  %v520_v17 = vmul.f32 0.6931472, %v889_v16 }
  0x70   : > { %v893_v32 = vpop.eup %892  ;;  %900 = vtanh.f32 %v554_v53  ;;  %v556_v21 = vadd.f32 %v518_v29, %v300_v14  ;;  %v462_v33 = vadd.f32 1.0, %v891_v20 }
  0x71   : > { %v895_v35 = vpop.eup %894  ;;  %902 = vtanh.f32 %v555_v28  ;;  %v557_v36 = vadd.f32 %v520_v17, %v301_v25  ;;  %v463_v37 = vadd.f32 1.0, %v893_v32 }
  0x72   : > { %904 = vtanh.f32 %v556_v21  ;;  %v464_v38 = vadd.f32 1.0, %v895_v35  ;;  %v897_v39 = vpop.eup %896 }
  0x73   : > { %906 = vtanh.f32 %v557_v36  ;;  %v465_v6 = vadd.f32 1.0, %v897_v39 }
  0x74   : > { %908 = vlog2.f32 %v462_v33 }
  0x75   : > { %v899_v48 = vpop.eup %898  ;;  %910 = vlog2.f32 %v463_v37 }
  0x76   : > { %v901_v26 = vpop.eup %900  ;;  %v617_v60 = vmul.f32 %v899_v48, %v1193_v58  ;;  %912 = vlog2.f32 %v464_v38  ;;  %v302_v58 = vmax.f32 %v1250_v5, 0.0 }
  0x77   : > { %v903_v49 = vpop.eup %902  ;;  %v618_v22 = vmul.f32 %v901_v26, %v1197_v41  ;;  %914 = vlog2.f32 %v465_v6 }
  0x78   : > { %v905_v44 = vpop.eup %904  ;;  %650 = vst.msk [vmem:[%s1112_s24 + $0xb0] sm:$0xff] %vm627_vm0, %v617_v60  ;;  %v619_v50 = vmul.f32 %v903_v49, %v1217_v30  ;;  %916 = vpow2.f32 %v433_v42  ;;  %v304_v30 = vmax.f32 %v1272_v18, 0.0 }
  0x79   : > { %v907_v51 = vpop.eup %906  ;;  %651 = vst.msk [vmem:[%s1112_s24 + $0xb8] sm:$0xff] %vm627_vm0, %v618_v22  ;;  %v620_v47 = vmul.f32 %v905_v44, %v1225_v43  ;;  %v305_v43 = vmax.f32 %v1278_v54, 0.0 }
  0x7a   : > { %v909_v55 = vpop.eup %908  ;;  %652 = vst.msk [vmem:[%s1112_s24 + $0xc0] sm:$0xff] %vm627_vm0, %v619_v50  ;;  %v621_v41 = vmul.f32 %v907_v51, %v1228_v59 }
  0x7b   : > { %v911_v62 = vpop.eup %910  ;;  %653 = vst.msk [vmem:[%s1112_s24 + $0xc8] sm:$0xff] %vm627_vm0, %v620_v47  ;;  %v522_v52 = vmul.f32 0.6931472, %v909_v55 }
  0x7c   : > { %v913_v2 = vpop.eup %912  ;;  %654 = vst.msk [vmem:[%s1112_s24 + $0xd0] sm:$0xff] %vm627_vm0, %v621_v41  ;;  %v524_v3 = vmul.f32 0.6931472, %v911_v62 }
  0x7d   : > { %v915_v0 = vpop.eup %914  ;;  %v558_v4 = vadd.f32 %v522_v52, %v302_v58  ;;  %v526_v24 = vmul.f32 0.6931472, %v913_v2 }
  0x7e   : > { %v917_v7 = vpop.eup %916  ;;  %v559_v45 = vadd.f32 %v524_v3, %v303_v61  ;;  %v528_v59 = vmul.f32 0.6931472, %v915_v0 }
  0x7f   : > { %918 = vtanh.f32 %v558_v4  ;;  %v560_v34 = vadd.f32 %v526_v24, %v304_v30  ;;  %v466_v8 = vadd.f32 1.0, %v917_v7 }
  0x80   : > { %920 = vtanh.f32 %v559_v45  ;;  %v561_v9 = vadd.f32 %v528_v59, %v305_v43 }
  0x81   : > { %922 = vtanh.f32 %v560_v34 }
  0x82   : > { %924 = vtanh.f32 %v561_v9 }
  0x83   : > { %926 = vlog2.f32 %v466_v8 }
  0x85   : > { %v919_v40 = vpop.eup %918 }
  0x86   : > { %v921_v10 = vpop.eup %920  ;;  %v622_v1 = vmul.f32 %v919_v40, %v1250_v5 }
  0x87   : > { %v923_v11 = vpop.eup %922  ;;  %v623_v31 = vmul.f32 %v921_v10, %v1262_v13 }
  0x88   : > { %v925_v15 = vpop.eup %924  ;;  %655 = vst.msk [vmem:[%s1112_s24 + $0xd8] sm:$0xff] %vm627_vm0, %v622_v1  ;;  %v624_v12 = vmul.f32 %v923_v11, %v1272_v18 }
  0x89   : > { %v927_v14 = vpop.eup %926  ;;  %656 = vst.msk [vmem:[%s1112_s24 + $0xe0] sm:$0xff] %vm627_vm0, %v623_v31  ;;  %v625_v23 = vmul.f32 %v925_v15, %v1278_v54 }
  0x8a   : > { %657 = vst.msk [vmem:[%s1112_s24 + $0xe8] sm:$0xff] %vm627_vm0, %v624_v12  ;;  %v530_v27 = vmul.f32 0.6931472, %v927_v14 }
  0x8b   : > { %658 = vst.msk [vmem:[%s1112_s24 + $0xf0] sm:$0xff] %vm627_vm0, %v625_v23 }
  0x8c   : > { %v562_v5 = vadd.f32 %v530_v27, %v306_v57 }
  0x8e   : > { %928 = vtanh.f32 %v562_v5 }
  0x94   : > { %v929_v13 = vpop.eup %928 }
  0x95   : > { %v626_v46 = vmul.f32 %v929_v13, %v1284_v56 }
  0x97   : > { %659 = vst.msk [vmem:[%s1112_s24 + $0xf8] sm:$0xff] %vm627_vm0, %v626_v46 }
  0x98 PF: > { %s13_s12 = sadd.s32 1, %s936_s12  }
  0x99   : > { %p10_p4 = scmp.ge.s32.totalorder %s13_s12, 4  }
  0x9b   :  { %12 = sbr.rel (!%p10_p4) target bundleno = 1 (0x1), region = 62 }

</bundles_post_ra>
